<compile_context>
chip_gen: v5e
topology: v5e:2x2
jax: 0.10.0
libtpu: 0.0.40
codegen_flags: <defaults>
</compile_context>

<pallas_src>
import functools
import math

import jax
import jax.numpy as jnp
from jax import lax
from jax.experimental import pallas as pl
from jax.experimental.pallas import tpu as pltpu

_BISECT_ITERS = 32  # f32 mantissa is 24 bits; 32 halvings ~ machine precision.


def _nma_kernel(w_ref, q_ref, k_ref, v_ref, o_ref, *, scale, topk_sizes):
    # Block shapes (batch & head dims squeezed away by the BlockSpecs):
    #   q_ref: (TL, E)   k_ref: (S, E)   v_ref: (S, D)   o_ref: (TL, D)
    #   w_ref: (n_ratios,) in SMEM
    q = q_ref[...]
    q_scaled = q * scale                      # fold scale into q (TL*E muls)

    # scores = (q*scale) @ k^T on the MXU, f32 accumulate, operands in the
    # input dtype (bf16 stays bf16).
    scores = lax.dot_general(
        q_scaled, k_ref[...], (((1,), (1,)), ((), ())),
        preferred_element_type=jnp.float32)   # (TL, S) f32

    row_max = jnp.max(scores, axis=-1, keepdims=True)   # (TL, 1)
    row_min = jnp.min(scores, axis=-1, keepdims=True)   # (TL, 1)

    def kth_threshold(kk):
        # Bisection for the kk-th largest value per row: keep the invariant
        # count(scores >= lo) >= kk and count(scores >= hi) < kk.
        kkf = jnp.float32(kk)

        def body(_, carry):
            lo, hi = carry
            mid = 0.5 * (lo + hi)
            cnt = jnp.sum(jnp.where(scores >= mid, 1.0, 0.0),
                          axis=-1, keepdims=True)        # (TL, 1)
            ge = cnt >= kkf
            return jnp.where(ge, mid, lo), jnp.where(ge, hi, mid)

        lo, _ = lax.fori_loop(0, _BISECT_ITERS, body,
                              (row_min, row_max + 1.0))
        return lo                                         # (TL, 1)

    # One exp pass.  The row max is a member of every top-k set (k_i >= 1),
    # so using the global row max is exactly the stable softmax of each
    # masked branch.
    e = jnp.exp(scores - row_max)                         # (TL, S) f32

    # Static ascending-k order => nested keep sets (thr descending).
    order = sorted(range(len(topk_sizes)), key=lambda i: topk_sizes[i])
    ks_sorted = [topk_sizes[i] for i in order]

    thrs, denoms = [], []
    for kk in ks_sorted:
        thr = kth_threshold(kk)                           # (TL, 1)
        denom = jnp.sum(jnp.where(scores >= thr, e, 0.0),
                        axis=-1, keepdims=True)           # (TL, 1) >= 1
        thrs.append(thr)
        denoms.append(denom)

    # Cumulative per-row coefficients: an element in keep set `pos` (and by
    # nesting all looser sets) gets sum_{j>=pos} w_j / denom_j.
    n = len(order)
    levels = [None] * n
    c = jnp.zeros_like(row_max)
    for pos in range(n - 1, -1, -1):
        c = c + w_ref[order[pos]] / denoms[pos]           # scalar SMEM read
        levels[pos] = c

    # Nested selects (inclusive ties: scores >= thr), tightest set wins.
    coef = jnp.zeros_like(scores)
    for pos in range(n - 1, -1, -1):
        coef = jnp.where(scores >= thrs[pos], levels[pos], coef)

    w = e * coef                                          # (TL, S) f32

    # Single attn @ V matmul per (b, h, l-tile).
    o_ref[...] = jnp.dot(w.astype(v_ref.dtype), v_ref[...],
                         preferred_element_type=jnp.float32).astype(o_ref.dtype)


def _pick_vmem_limit():
    # ~3/4 of physical VMEM: ~48 MiB on v7x (64 MiB), ~96 MiB on v5e/v6e.
    try:
        cap = pltpu.get_tpu_info().vmem_capacity_bytes
    except Exception:
        cap = 64 * 1024 * 1024
    return max(32 * 1024 * 1024, int(cap) * 3 // 4)


def nma_forward(queries, keys, values, attn_weights,
                topk_ratios=(0.67, 0.75, 0.8), scale=None):
    """Pallas implementation of NMA.forward (eval mode). Returns (out, None)."""
    B, L, H, E = queries.shape
    _, S, _, D = values.shape
    scale = scale if scale is not None else 1.0 / math.sqrt(E)
    # Guard: int(S*r) == 0 would mask every score and give NaN softmax rows.
    topk_sizes = tuple(max(1, int(S * r)) for r in topk_ratios)

    # One-time layout change: per-head contiguous (rows, lanes) tiles.
    qT = jnp.transpose(queries, (0, 2, 1, 3))   # (B, H, L, E)
    kT = jnp.transpose(keys, (0, 2, 1, 3))      # (B, H, S, E)
    vT = jnp.transpose(values, (0, 2, 1, 3))    # (B, H, S, D)

    TL = min(L, 256)                            # fill the 256-wide MXU M dim
    grid = (B, H, pl.cdiv(L, TL))

    kernel = functools.partial(_nma_kernel, scale=float(scale),
                               topk_sizes=topk_sizes)

    out_bhld = pl.pallas_call(
        kernel,
        out_shape=jax.ShapeDtypeStruct((B, H, L, D), queries.dtype),
        grid_spec=pltpu.PrefetchScalarGridSpec(
            num_scalar_prefetch=0,
            grid=grid,
            in_specs=[
                # attn_weights: small parameter vector in SMEM.
                pl.BlockSpec(memory_space=pltpu.MemorySpace.SMEM),
                pl.BlockSpec((None, None, TL, E), lambda b, h, lt: (b, h, lt, 0)),
                pl.BlockSpec((None, None, S, E), lambda b, h, lt: (b, h, 0, 0)),
                pl.BlockSpec((None, None, S, D), lambda b, h, lt: (b, h, 0, 0)),
            ],
            out_specs=pl.BlockSpec((None, None, TL, D),
                                   lambda b, h, lt: (b, h, lt, 0)),
        ),
        compiler_params=pltpu.CompilerParams(
            dimension_semantics=("parallel", "parallel", "parallel"),
            vmem_limit_bytes=_pick_vmem_limit()),
    )(attn_weights, qT, kT, vT)

    out = jnp.transpose(out_bhld, (0, 2, 1, 3))  # (B, L, H, D)
    return out, None


def nma_reference(queries, keys, values, attn_weights,
                  topk_ratios=(0.67, 0.75, 0.8), scale=None):
    """Pure-JAX reference mirroring the torch forward (eval mode)."""
    B, L, H, E = queries.shape
    S = values.shape[1]
    scale = scale if scale is not None else 1.0 / math.sqrt(E)
    scores = jnp.einsum('blhe,bshe->bhls', queries, keys) * scale
    out = 0.0
    for i, r in enumerate(topk_ratios):
        kk = max(1, int(S * r))
        thr = jax.lax.top_k(scores, kk)[0][..., -1:]
        masked = jnp.where(scores >= thr, scores, -jnp.inf)
        attn = jax.nn.softmax(masked, axis=-1)
        out = out + jnp.einsum('bhls,bshd->blhd', attn, values) * attn_weights[i]
    return out


if __name__ == "__main__":
    # Small shapes consistent with the module: (B, L, H, E) and (B, S, H, D)
    B, L, S, H, E, D = 2, 8, 8, 4, 32, 32
    key = jax.random.PRNGKey(0)
    kq, kk_, kv = jax.random.split(key, 3)

    queries = jax.random.normal(kq, (B, L, H, E), dtype=jnp.float32)
    keys_ = jax.random.normal(kk_, (B, S, H, E), dtype=jnp.float32)
    values = jax.random.normal(kv, (B, S, H, D), dtype=jnp.float32)

    # Parameter: attn_weights initialized to ones (as in __init__)
    topk_ratios = (0.67, 0.75, 0.8)
    attn_weights = jnp.ones((len(topk_ratios),), dtype=jnp.float32)

    out, _ = nma_forward(queries, keys_, values, attn_weights, topk_ratios)
    out = jax.block_until_ready(out)

    ref = nma_reference(queries, keys_, values, attn_weights, topk_ratios)
    assert out.shape == (B, L, H, D)
    assert jnp.allclose(out, ref, atol=1e-4, rtol=1e-4), "mismatch vs reference"

    print("KERNEL_OK")
</pallas_src>

<mosaic_0001>
module attributes {stable_mosaic.version = 11 : i64} {
  func.func @_nma_kernel(%arg0: i32, %arg1: i32, %arg2: i32, %arg3: memref<3xf32, #tpu.memory_space<smem>>, %arg4: memref<1x1x8x32xf32, #tpu.memory_space<vmem>>, %arg5: memref<1x1x8x32xf32, #tpu.memory_space<vmem>>, %arg6: memref<1x1x8x32xf32, #tpu.memory_space<vmem>>, %arg7: memref<1x1x8x32xf32, #tpu.memory_space<vmem>>) attributes {dimension_semantics = [#tpu.dimension_semantics<parallel>, #tpu.dimension_semantics<parallel>, #tpu.dimension_semantics<parallel>], iteration_bounds = array<i64: 2, 4, 1>, scalar_prefetch = 0 : i64, scratch_operands = 0 : i64, tpu.core_type = #tpu.core_type<tc>, window_params = [{transform_indices = @transform_0, window_bounds = array<i64: 3>}, {transform_indices = @transform_1, window_bounds = array<i64: 1, 1, 8, 32>}, {transform_indices = @transform_2, window_bounds = array<i64: 1, 1, 8, 32>}, {transform_indices = @transform_3, window_bounds = array<i64: 1, 1, 8, 32>}, {transform_indices = @transform_4, window_bounds = array<i64: 1, 1, 8, 32>}]} {
    %c0 = arith.constant 0 : index
    %c0_0 = arith.constant 0 : index
    %c0_1 = arith.constant 0 : index
    %c0_2 = arith.constant 0 : index
    %0 = vector.load %arg4[%c0, %c0_0, %c0_1, %c0_2] : memref<1x1x8x32xf32, #tpu.memory_space<vmem>>, vector<1x1x8x32xf32>
    %1 = vector.shape_cast %0 : vector<1x1x8x32xf32> to vector<8x32xf32>
    %cst = arith.constant 0.176776692 : f32
    %2 = vector.broadcast %cst : f32 to vector<8x32xf32>
    %3 = arith.mulf %1, %2 : vector<8x32xf32>
    %c0_3 = arith.constant 0 : index
    %c0_4 = arith.constant 0 : index
    %c0_5 = arith.constant 0 : index
    %c0_6 = arith.constant 0 : index
    %4 = vector.load %arg5[%c0_3, %c0_4, %c0_5, %c0_6] : memref<1x1x8x32xf32, #tpu.memory_space<vmem>>, vector<1x1x8x32xf32>
    %5 = vector.shape_cast %4 : vector<1x1x8x32xf32> to vector<8x32xf32>
    %cst_7 = arith.constant dense<0.000000e+00> : vector<8x8xf32>
    %6 = tpu.matmul %3, %5, %cst_7 {dimension_numbers = #tpu.dot_dimension_numbers<[1], [1], [0], [0], [0, 0, 1, 0], [], []>} : vector<8x32xf32>, vector<8x32xf32>, vector<8x8xf32> -> vector<8x8xf32>
    %cst_8 = arith.constant dense<0xFF800000> : vector<8xf32>
    %7 = vector.multi_reduction <maximumf>, %6, %cst_8 [1] : vector<8x8xf32> to vector<8xf32>
    %8 = vector.shape_cast %7 : vector<8xf32> to vector<8x1xf32>
    %cst_9 = arith.constant dense<0x7F800000> : vector<8xf32>
    %9 = vector.multi_reduction <minimumf>, %6, %cst_9 [1] : vector<8x8xf32> to vector<8xf32>
    %10 = vector.shape_cast %9 : vector<8xf32> to vector<8x1xf32>
    %11 = vector.broadcast %8 : vector<8x1xf32> to vector<8x8xf32>
    %12 = arith.subf %6, %11 : vector<8x8xf32>
    %13 = math.exp %12 : vector<8x8xf32>
    %cst_10 = arith.constant 1.000000e+00 : f32
    %14 = vector.broadcast %cst_10 : f32 to vector<8x1xf32>
    %15 = arith.addf %8, %14 : vector<8x1xf32>
    %cst_11 = arith.constant 5.000000e+00 : f32
    %c0_i32 = arith.constant 0 : i32
    %c32_i32 = arith.constant 32 : i32
    %16 = arith.addi %c0_i32, %c32_i32 : i32
    %c1_i32 = arith.constant 1 : i32
    %17:2 = scf.for %arg8 = %c0_i32 to %16 step %c1_i32 iter_args(%arg9 = %10, %arg10 = %15) -> (vector<8x1xf32>, vector<8x1xf32>)  : i32 {
      %80 = arith.addf %arg9, %arg10 : vector<8x1xf32>
      %cst_40 = arith.constant 5.000000e-01 : f32
      %81 = vector.broadcast %cst_40 : f32 to vector<8x1xf32>
      %82 = arith.mulf %81, %80 : vector<8x1xf32>
      %83 = vector.broadcast %82 : vector<8x1xf32> to vector<8x8xf32>
      %84 = arith.cmpf oge, %6, %83 : vector<8x8xf32>
      %cst_41 = arith.constant 1.000000e+00 : f32
      %cst_42 = arith.constant 0.000000e+00 : f32
      %85 = vector.broadcast %cst_41 : f32 to vector<8x8xf32>
      %86 = vector.broadcast %cst_42 : f32 to vector<8x8xf32>
      %87 = arith.select %84, %85, %86 : vector<8x8xi1>, vector<8x8xf32>
      %cst_43 = arith.constant dense<0.000000e+00> : vector<8xf32>
      %88 = vector.multi_reduction <add>, %87, %cst_43 [1] : vector<8x8xf32> to vector<8xf32>
      %89 = vector.shape_cast %88 : vector<8xf32> to vector<8x1xf32>
      %90 = vector.broadcast %cst_11 : f32 to vector<8x1xf32>
      %91 = arith.cmpf oge, %89, %90 : vector<8x1xf32>
      %92 = arith.select %91, %82, %arg9 : vector<8x1xi1>, vector<8x1xf32>
      %93 = arith.select %91, %arg10, %82 : vector<8x1xi1>, vector<8x1xf32>
      scf.yield %92, %93 : vector<8x1xf32>, vector<8x1xf32>
    }
    %18 = vector.broadcast %17#0 : vector<8x1xf32> to vector<8x8xf32>
    %19 = arith.cmpf oge, %6, %18 : vector<8x8xf32>
    %cst_12 = arith.constant 0.000000e+00 : f32
    %20 = vector.broadcast %cst_12 : f32 to vector<8x8xf32>
    %21 = arith.select %19, %13, %20 : vector<8x8xi1>, vector<8x8xf32>
    %cst_13 = arith.constant dense<0.000000e+00> : vector<8xf32>
    %22 = vector.multi_reduction <add>, %21, %cst_13 [1] : vector<8x8xf32> to vector<8xf32>
    %23 = vector.shape_cast %22 : vector<8xf32> to vector<8x1xf32>
    %cst_14 = arith.constant 1.000000e+00 : f32
    %24 = vector.broadcast %cst_14 : f32 to vector<8x1xf32>
    %25 = arith.addf %8, %24 : vector<8x1xf32>
    %cst_15 = arith.constant 6.000000e+00 : f32
    %c0_i32_16 = arith.constant 0 : i32
    %c32_i32_17 = arith.constant 32 : i32
    %26 = arith.addi %c0_i32_16, %c32_i32_17 : i32
    %c1_i32_18 = arith.constant 1 : i32
    %27:2 = scf.for %arg8 = %c0_i32_16 to %26 step %c1_i32_18 iter_args(%arg9 = %10, %arg10 = %25) -> (vector<8x1xf32>, vector<8x1xf32>)  : i32 {
      %80 = arith.addf %arg9, %arg10 : vector<8x1xf32>
      %cst_40 = arith.constant 5.000000e-01 : f32
      %81 = vector.broadcast %cst_40 : f32 to vector<8x1xf32>
      %82 = arith.mulf %81, %80 : vector<8x1xf32>
      %83 = vector.broadcast %82 : vector<8x1xf32> to vector<8x8xf32>
      %84 = arith.cmpf oge, %6, %83 : vector<8x8xf32>
      %cst_41 = arith.constant 1.000000e+00 : f32
      %cst_42 = arith.constant 0.000000e+00 : f32
      %85 = vector.broadcast %cst_41 : f32 to vector<8x8xf32>
      %86 = vector.broadcast %cst_42 : f32 to vector<8x8xf32>
      %87 = arith.select %84, %85, %86 : vector<8x8xi1>, vector<8x8xf32>
      %cst_43 = arith.constant dense<0.000000e+00> : vector<8xf32>
      %88 = vector.multi_reduction <add>, %87, %cst_43 [1] : vector<8x8xf32> to vector<8xf32>
      %89 = vector.shape_cast %88 : vector<8xf32> to vector<8x1xf32>
      %90 = vector.broadcast %cst_15 : f32 to vector<8x1xf32>
      %91 = arith.cmpf oge, %89, %90 : vector<8x1xf32>
      %92 = arith.select %91, %82, %arg9 : vector<8x1xi1>, vector<8x1xf32>
      %93 = arith.select %91, %arg10, %82 : vector<8x1xi1>, vector<8x1xf32>
      scf.yield %92, %93 : vector<8x1xf32>, vector<8x1xf32>
    }
    %28 = vector.broadcast %27#0 : vector<8x1xf32> to vector<8x8xf32>
    %29 = arith.cmpf oge, %6, %28 : vector<8x8xf32>
    %cst_19 = arith.constant 0.000000e+00 : f32
    %30 = vector.broadcast %cst_19 : f32 to vector<8x8xf32>
    %31 = arith.select %29, %13, %30 : vector<8x8xi1>, vector<8x8xf32>
    %cst_20 = arith.constant dense<0.000000e+00> : vector<8xf32>
    %32 = vector.multi_reduction <add>, %31, %cst_20 [1] : vector<8x8xf32> to vector<8xf32>
    %33 = vector.shape_cast %32 : vector<8xf32> to vector<8x1xf32>
    %cst_21 = arith.constant 1.000000e+00 : f32
    %34 = vector.broadcast %cst_21 : f32 to vector<8x1xf32>
    %35 = arith.addf %8, %34 : vector<8x1xf32>
    %cst_22 = arith.constant 6.000000e+00 : f32
    %c0_i32_23 = arith.constant 0 : i32
    %c32_i32_24 = arith.constant 32 : i32
    %36 = arith.addi %c0_i32_23, %c32_i32_24 : i32
    %c1_i32_25 = arith.constant 1 : i32
    %37:2 = scf.for %arg8 = %c0_i32_23 to %36 step %c1_i32_25 iter_args(%arg9 = %10, %arg10 = %35) -> (vector<8x1xf32>, vector<8x1xf32>)  : i32 {
      %80 = arith.addf %arg9, %arg10 : vector<8x1xf32>
      %cst_40 = arith.constant 5.000000e-01 : f32
      %81 = vector.broadcast %cst_40 : f32 to vector<8x1xf32>
      %82 = arith.mulf %81, %80 : vector<8x1xf32>
      %83 = vector.broadcast %82 : vector<8x1xf32> to vector<8x8xf32>
      %84 = arith.cmpf oge, %6, %83 : vector<8x8xf32>
      %cst_41 = arith.constant 1.000000e+00 : f32
      %cst_42 = arith.constant 0.000000e+00 : f32
      %85 = vector.broadcast %cst_41 : f32 to vector<8x8xf32>
      %86 = vector.broadcast %cst_42 : f32 to vector<8x8xf32>
      %87 = arith.select %84, %85, %86 : vector<8x8xi1>, vector<8x8xf32>
      %cst_43 = arith.constant dense<0.000000e+00> : vector<8xf32>
      %88 = vector.multi_reduction <add>, %87, %cst_43 [1] : vector<8x8xf32> to vector<8xf32>
      %89 = vector.shape_cast %88 : vector<8xf32> to vector<8x1xf32>
      %90 = vector.broadcast %cst_22 : f32 to vector<8x1xf32>
      %91 = arith.cmpf oge, %89, %90 : vector<8x1xf32>
      %92 = arith.select %91, %82, %arg9 : vector<8x1xi1>, vector<8x1xf32>
      %93 = arith.select %91, %arg10, %82 : vector<8x1xi1>, vector<8x1xf32>
      scf.yield %92, %93 : vector<8x1xf32>, vector<8x1xf32>
    }
    %38 = vector.broadcast %37#0 : vector<8x1xf32> to vector<8x8xf32>
    %39 = arith.cmpf oge, %6, %38 : vector<8x8xf32>
    %cst_26 = arith.constant 0.000000e+00 : f32
    %40 = vector.broadcast %cst_26 : f32 to vector<8x8xf32>
    %41 = arith.select %39, %13, %40 : vector<8x8xi1>, vector<8x8xf32>
    %cst_27 = arith.constant dense<0.000000e+00> : vector<8xf32>
    %42 = vector.multi_reduction <add>, %41, %cst_27 [1] : vector<8x8xf32> to vector<8xf32>
    %43 = vector.shape_cast %42 : vector<8xf32> to vector<8x1xf32>
    %cst_28 = arith.constant 0.000000e+00 : f32
    %44 = vector.broadcast %cst_28 : f32 to vector<8x1xf32>
    %c2 = arith.constant 2 : index
    %45 = memref.load %arg3[%c2] : memref<3xf32, #tpu.memory_space<smem>>
    %46 = vector.broadcast %45 : f32 to vector<8x1xf32>
    %47 = arith.divf %46, %43 : vector<8x1xf32>
    %48 = arith.addf %44, %47 : vector<8x1xf32>
    %c1 = arith.constant 1 : index
    %49 = memref.load %arg3[%c1] : memref<3xf32, #tpu.memory_space<smem>>
    %50 = vector.broadcast %49 : f32 to vector<8x1xf32>
    %51 = arith.divf %50, %33 : vector<8x1xf32>
    %52 = arith.addf %48, %51 : vector<8x1xf32>
    %c0_29 = arith.constant 0 : index
    %53 = memref.load %arg3[%c0_29] : memref<3xf32, #tpu.memory_space<smem>>
    %54 = vector.broadcast %53 : f32 to vector<8x1xf32>
    %55 = arith.divf %54, %23 : vector<8x1xf32>
    %56 = arith.addf %52, %55 : vector<8x1xf32>
    %cst_30 = arith.constant 0.000000e+00 : f32
    %57 = vector.broadcast %cst_30 : f32 to vector<8x8xf32>
    %58 = vector.broadcast %37#0 : vector<8x1xf32> to vector<8x8xf32>
    %59 = arith.cmpf oge, %6, %58 : vector<8x8xf32>
    %60 = vector.shape_cast %48 : vector<8x1xf32> to vector<8x1xf32>
    %61 = vector.broadcast %60 : vector<8x1xf32> to vector<8x8xf32>
    %62 = arith.select %59, %61, %57 : vector<8x8xi1>, vector<8x8xf32>
    %63 = vector.broadcast %27#0 : vector<8x1xf32> to vector<8x8xf32>
    %64 = arith.cmpf oge, %6, %63 : vector<8x8xf32>
    %65 = vector.shape_cast %52 : vector<8x1xf32> to vector<8x1xf32>
    %66 = vector.broadcast %65 : vector<8x1xf32> to vector<8x8xf32>
    %67 = arith.select %64, %66, %62 : vector<8x8xi1>, vector<8x8xf32>
    %68 = vector.broadcast %17#0 : vector<8x1xf32> to vector<8x8xf32>
    %69 = arith.cmpf oge, %6, %68 : vector<8x8xf32>
    %70 = vector.shape_cast %56 : vector<8x1xf32> to vector<8x1xf32>
    %71 = vector.broadcast %70 : vector<8x1xf32> to vector<8x8xf32>
    %72 = arith.select %69, %71, %67 : vector<8x8xi1>, vector<8x8xf32>
    %73 = arith.mulf %13, %72 : vector<8x8xf32>
    %c0_31 = arith.constant 0 : index
    %c0_32 = arith.constant 0 : index
    %c0_33 = arith.constant 0 : index
    %c0_34 = arith.constant 0 : index
    %74 = vector.load %arg6[%c0_31, %c0_32, %c0_33, %c0_34] : memref<1x1x8x32xf32, #tpu.memory_space<vmem>>, vector<1x1x8x32xf32>
    %75 = vector.shape_cast %74 : vector<1x1x8x32xf32> to vector<8x32xf32>
    %cst_35 = arith.constant dense<0.000000e+00> : vector<8x32xf32>
    %76 = tpu.matmul %73, %75, %cst_35 {dimension_numbers = #tpu.dot_dimension_numbers<[1], [0], [0], [1], [0, 0, 1, 1], [], []>} : vector<8x8xf32>, vector<8x32xf32>, vector<8x32xf32> -> vector<8x32xf32>
    %c0_36 = arith.constant 0 : index
    %c0_37 = arith.constant 0 : index
    %c0_38 = arith.constant 0 : index
    %c0_39 = arith.constant 0 : index
    %77 = vector.load %arg7[%c0_36, %c0_37, %c0_38, %c0_39] : memref<1x1x8x32xf32, #tpu.memory_space<vmem>>, vector<1x1x8x32xf32>
    %78 = vector.shape_cast %77 : vector<1x1x8x32xf32> to vector<8x32xf32>
    %79 = vector.shape_cast %76 : vector<8x32xf32> to vector<1x1x8x32xf32>
    tpu.vector_store %arg7[%c0_36, %c0_37, %c0_38, %c0_39], %79 {strides = array<i32>} : memref<1x1x8x32xf32, #tpu.memory_space<vmem>>, vector<1x1x8x32xf32>,
    return
  }
  func.func @transform_0(%arg0: i32, %arg1: i32, %arg2: i32) -> i32 {
    %c0_i32 = arith.constant 0 : i32
    %c0_i32_0 = arith.constant 0 : i32
    return %c0_i32 : i32
  }
  func.func @transform_1(%arg0: i32, %arg1: i32, %arg2: i32) -> (i32, i32, i32, i32) {
    %c0_i32 = arith.constant 0 : i32
    %c0_i32_0 = arith.constant 0 : i32
    return %arg0, %arg1, %arg2, %c0_i32 : i32, i32, i32, i32
  }
  func.func @transform_2(%arg0: i32, %arg1: i32, %arg2: i32) -> (i32, i32, i32, i32) {
    %c0_i32 = arith.constant 0 : i32
    %c0_i32_0 = arith.constant 0 : i32
    %c0_i32_1 = arith.constant 0 : i32
    return %arg0, %arg1, %c0_i32, %c0_i32_0 : i32, i32, i32, i32
  }
  func.func @transform_3(%arg0: i32, %arg1: i32, %arg2: i32) -> (i32, i32, i32, i32) {
    %c0_i32 = arith.constant 0 : i32
    %c0_i32_0 = arith.constant 0 : i32
    %c0_i32_1 = arith.constant 0 : i32
    return %arg0, %arg1, %c0_i32, %c0_i32_0 : i32, i32, i32, i32
  }
  func.func @transform_4(%arg0: i32, %arg1: i32, %arg2: i32) -> (i32, i32, i32, i32) {
    %c0_i32 = arith.constant 0 : i32
    %c0_i32_0 = arith.constant 0 : i32
    return %arg0, %arg1, %arg2, %c0_i32 : i32, i32, i32, i32
  }
}

</mosaic_0001>

<bundles_post_ra>
// kernel: tpu_custom_call.1
= control target key start
LH: loop header
LB: loop body
LE: loop exit
PB: predicated region body
PF: predicated region fallthrough
CT: control target
= control target key end

     0   :  { %s1422_s0 = inlined_call_operand.hbm [shape: f32[3], index: 0, kind: input, shape index: {}]   ;;  %s1423_s1 = inlined_call_operand.hbm [shape: f32[2,4,8,32], index: 1, kind: input, shape index: {}]   ;;  %s1424_s2 = inlined_call_operand.hbm [shape: f32[2,4,8,32], index: 2, kind: input, shape index: {}]   ;;  %s1425_s3 = inlined_call_operand.hbm [shape: f32[2,4,8,32], index: 3, kind: input, shape index: {}]   ;;  %s1426_s4 = inlined_call_operand.hbm [shape: f32[2,4,8,32], index: 4, kind: output, shape index: {}]  }
   0x1   :  { %1432 = sst [smem:[#allocation20_spill]] %s1422_s0 }
   0x2   :  { %1433 = sst [smem:[#allocation21_spill]] %s1423_s1 }
   0x3   :  { %1434 = sst [smem:[#allocation22_spill]] %s1424_s2 }
   0x4   :  { %9 = vsyncpa [#allocation5], 0 }
   0x5   :  { %10 = vsyncpa [#allocation3], 0 }
   0x6   :  { %12 = vsyncpa [#allocation3 + $0x1], 0 }
   0x7   :  { %13 = vsyncpa [#allocation8], 0 }
   0x8   :  { %15 = vsyncpa [#allocation8 + $0x1], 0 }
   0x9   :  { %16 = vsyncpa [#allocation4], 0 }
   0xa   :  { %18 = vsyncpa [#allocation4 + $0x1], 0  ;;  %s1161_s15 = smov 0   ;;  %s1163_s16 = smov 0  }
   0xb   :  { %s1165_s17 = smov 0   ;;  %s1167_s18 = smov 0  }
   0xc   :  { %s1169_s19 = smov 0   ;;  %s1171_s20 = smov 0  }
   0xd   :  { %s1173_s21 = smov 0   ;;  %s1175_s22 = smov 0  }
   0xe LB: > { %1435 = sst [smem:[#allocation15_spill]] %s1099_s20  ;;  %s39_s23 = sadd.s32 1, %s1099_s20  ;;  %s1107_s22 = sphi %s1175_s22, %s24_s22   ;;  %s1103_s21 = sphi %s1173_s21, %s1456_s21   ;;  %s1099_s20 = sphi %s1171_s20, %s1455_s20   ;;  %s1095_s19 = sphi %s1169_s19, %s1454_s19   ;;  %s1091_s18 = sphi %s1167_s18, %s1453_s18   ;;  %s1087_s17 = sphi %s1165_s17, %s1459_s17   ;;  %s1083_s16 = sphi %s1163_s16, %s1458_s16   ;;  %s1079_s15 = sphi %s1161_s15, %s1457_s15  }
   0xf   : > { %1436 = sst [smem:[#allocation16_spill]] %s1103_s21  ;;  %s43_s24 = sadd.s32 1, %s1103_s21 }
  0x10   : > { %p41_p0 = scmp.ge.s32.totalorder %s39_s23, 4  ;;  %s75_s25 = sadd.s32 1, %s1087_s17 }
  0x11   : > { %p82_p1 = scmp.ne.s32.totalorder %s1087_s17, %s1083_s16  ;;  %p83_p2 = scmp.eq.s32.totalorder %s1107_s22, 0 }
  0x12   : > { %s1461_s23 = smov (%p41_p0, %s39_s23), 0  ;;  %s1463_s24 = smov (!%p41_p0, %s43_s24), %s1103_s21 }
  0x13   : > { %1437 = sst [smem:[#allocation17_spill]] %s1461_s23  ;;  %s69_s26 = ssub.s32 %s1099_s20, %s1461_s23 }
  0x14   : > { %p84_p3 = por %p83_p2, %p82_p1  ;;  %p45_p4 = scmp.ge.s32.totalorder %s1463_s24, 2 }
  0x15   : > { %p748_p5 = scmp.lt.s32.totalorder %s1107_s22, 8  ;;  %s1427_s27 = sand.u32 1, %s1087_s17  }
  0x16   : > { %s1465_s24 = smov (%p45_p4, %s1463_s24), 0  ;;  %s1221_s28 = sshll.u32 %s1427_s27, 3 }
  0x17   : > { %1438 = sst [smem:[#allocation18_spill]] %s1465_s24  ;;  %s693_s29 = sshll.u32 %s1103_s21, 2 }
  0x18   : > { %s68_s30 = ssub.s32 %s1103_s21, %s1465_s24  ;;  %s217_s5 = sadd.s32 %s1099_s20, %s693_s29 }
  0x19   : > { %s70_s6 = sor.u32 %s69_s26, %s68_s30  ;;  %s1227_s7 = sshll.u32 %s217_s5, 3 }
  0x1a   : > { %p73_p6 = scmp.eq.s32.totalorder %s70_s6, 0  ;;  %p1229_p7 = pnand %p748_p5, %p84_p3 }
  0x1b   : > { %s230_s9 = sand.u32 1, %s1107_s22   ;;  %s1441_s2 = sld [smem:[#allocation22_spill]] }
  0x1c   : > { %s1235_s10 = scalar_select %p73_p6, %s1087_s17, %s75_s25  }
  0x1d   : > { %s234_s14 = scalar_lea.vmem [#allocation7], %s1221_s28  ;;  %s1242_s30 = scalar_lea.sflag [#allocation8], %s230_s9 }
  0x1e   : > { %1440 = sst [smem:[#allocation19_spill]] %s1235_s10  ;;  %s244_s26 = sshll.u32 %s234_s14, 4  ;;  %s245_s26 = int_to_ptr.vmem [resolvable:$true] %s244_s26 }
  0x1f   : > { %s1248_s25 = sadd.s32 4294967295, %s1107_s22   ;;  %s688_s5 = sadd.s32 4294967294, %s1107_s22  }
  0x20   : > { %p88_p8 = scmp.ne.s32.totalorder %s1083_s16, %s1079_s15  ;;  %p89_p9 = scmp.eq.s32.totalorder %s1248_s25, 0 }
  0x21   : > { %s240_s13 = scalar_lea.hbm %s1441_s2, %s1227_s7  ;;  %p172_p10 = scmp.eq.s32.totalorder %s1248_s25, 7 }
  0x22   : > { %s242_s29 = sshll.u32 %s240_s13, 4  ;;  %p178_p11 = scmp.eq.s32.totalorder %s688_s5, 7  ;;  %s243_s29 = int_to_ptr.hbm [resolvable:$true] %s242_s29 }
  0x23   : > { %739 = dma.hbm_to_vmem [thread:$0]  (!%p1229_p7), %s243_s29, 128, %s245_s26, %s1242_s30  }
  0x24   : > { %p689_p12 = scmp.ge.s32.totalorder %s1107_s22, 1  ;;  %p1258_p13 = por %p89_p9, %p88_p8 }
  0x25   : > { %p1265_p0 = por %p172_p10, %p82_p1  ;;  %p1269_p2 = por %p178_p11, %p88_p8 }
  0x26   : > { %p185_p3 = scmp.lt.s32.totalorder %s1107_s22, 9  ;;  %s1445_s0 = sld [smem:[#allocation20_spill]] }
  0x27   : > { %s1447_s1 = sld [smem:[#allocation21_spill]]  ;;  %s212_s2 = scalar_lea.vmem [#allocation6], %s1221_s28 }
  0x28   : > { %p1277_p4 = pnand %p689_p12, %p185_p3  ;;  %s223_s24 = sshll.u32 %s212_s2, 4  ;;  %s224_s24 = int_to_ptr.vmem [resolvable:$true] %s223_s24 }
  0x29   : > { %s1133_s13 = smov [#allocation2]   ;;  %s261_s29 = scalar_lea.hbm %s1425_s3, %s1227_s7 }
  0x2a   : > { %p729_p1 = pneg %p1277_p4  ;;  %s255_s5 = scalar_lea.vmem [#allocation9], %s1221_s28 }
  0x2b   : > { %s263_s10 = sshll.u32 %s261_s29, 4  ;;  %s264_s10 = int_to_ptr.hbm [resolvable:$true] %s263_s10 }
  0x2c   : > { %s197_s14 = sshll.u32 %s1445_s0, 4  ;;  %p730_p5 = pnand %p729_p1, %p89_p9  ;;  %s198_s14 = int_to_ptr.hbm [resolvable:$true] %s197_s14 }
  0x2d   : > { %s219_s27 = scalar_lea.hbm %s1447_s1, %s1227_s7  ;;  %s1448_s0 = sand.u32 1, %s1087_s17  }
  0x2e   : > { %s221_s12 = sshll.u32 %s219_s27, 4  ;;  %s209_s23 = scalar_lea.sflag [#allocation3], %s1448_s0  ;;  %s222_s12 = int_to_ptr.hbm [resolvable:$true] %s221_s12 }
  0x2f   : > { %732 = dma.hbm_to_smem (!%p730_p5), %s198_s14, 16, %s1133_s13, [#allocation5]  }
  0x30   : > { %736 = dma.hbm_to_vmem [thread:$0]  (!%p1229_p7), %s222_s12, 128, %s224_s24, %s209_s23  }
  0x31   : > { %s265_s1 = sshll.u32 %s255_s5, 4  ;;  %274 = sbr.rel (%p1277_p4) target bundleno = 966 (0x3c6), region = 36  ;;  %s266_s1 = int_to_ptr.vmem [resolvable:$true] %s265_s1 }
  0x32   : > { %742 = dma.hbm_to_vmem [thread:$0]  (!%p1229_p7), %s264_s10, 128, %s266_s1, %s1242_s30  }
  0x36   : > { %1062 = dma.done.wait (%p89_p9), [#allocation5], 16  }
  0x37   : > { %1064 = vsyncadd (%p89_p9), [#allocation5], 4294967280  ;;  %s1309_s0 = sand.u32 1, %s1083_s16  }
  0x38   : > { %s1312_s2 = sshll.u32 %s1309_s0, 3  ;;  %s282_s20 = scalar_lea.sflag [#allocation3], %s1309_s0 }
  0x39   : > { %s285_s1 = scalar_lea.vmem [#allocation6], %s1312_s2 }
  0x3a   : > { %1066 = dma.done.wait (%p1258_p13), %s282_s20, 128  }
  0x3b   : > { %1068 = vsyncadd (%p1258_p13), %s282_s20, 4294967168  ;;  %s291_s21 = sand.u32 1, %s1248_s25   ;;  %s295_s24 = scalar_lea.vmem [#allocation7], %s1312_s2 }
  0x3c   : > { %s292_s23 = scalar_lea.sflag [#allocation8], %s291_s21 }
  0x3d   : > { %1070 = dma.done.wait (%p1258_p13), %s292_s23, 256  }
  0x3e   : > { %1072 = vsyncadd (%p1258_p13), %s292_s23, 4294967040  ;;  %s305_s27 = scalar_lea.vmem [#allocation9], %s1312_s2 }
  0x3f   : > { %311 = sfence }
  0x40   : > { %v344_v0 = vld [vmem:[%s295_s24] sm:$0xff]  ;;  %vm345_vm0 = vcmask 261120   ;;  %v342_v1 = vld [vmem:[%s285_s1] sm:$0xff]  ;;  %vm372_vm1 = vcmask 64512   ;;  %s341_s28 = scalar_lea.vmem [#allocation10], %s1312_s2  ;;  %s1117_s7 = smov 0  }
  0x41   : > { %707 = vmatpush.xpose.msk.msra.mxu0 %vm345_vm0, %v344_v0  ;;  %v343_v2 = vmul.f32 0.17677669, %v342_v1 }
  0x44   : > { %708 = vmatmul.msk.f32.vlgmr.msra.gmra.mxu0 %vm345_vm0, %v343_v2 }
  0xc1   : > { %v1329_v3 = vpop.f32.mrf.mxu0 }
  0xc2   : > { %v373_v4 = vsel %vm372_vm1, %v1329_v3, -inf  ;;  %v376_v5 = vsel %vm372_vm1, %v1329_v3, inf }
  0xc3   : > { %374 = vmax.xlane.f32.xlu0 %v373_v4 }
  0xcb   : > { %377 = vmin.xlane.f32.xlu0 %v376_v5 }
 0x136   : > { %v375_v6 = vpop.xlane.xlu0 %374 }
 0x137   : > { %v379_v7 = vsub.f32 %v1329_v3, %v375_v6  ;;  %v382_v8 = vadd.f32 1.0, %v375_v6  }
 0x139   : > { %v380_v9 = vmul.f32 1.442695, %v379_v7  ;;  %v1109_v12 = vmov %v382_v8  }
 0x13b   : > { %866 = vpow2.f32 %v380_v9 }
 0x13e   : > { %v378_v10 = vpop.xlane.xlu0 %377  }
 0x13f   : > { %v1113_v13 = vmov %v378_v10  }
 0x141   : > { %v1336_v11 = vpop.eup %866 }
 0x142 LB: >> { %v391_v14 = vadd.f32 %v1111_v12, %v1115_v13  ;;  %v1134_v16 = vmov 0.0   ;;  %s388_s7 = sadd.s32 1, %s1119_s7   ;;  %s1119_s7 = sphi %s1117_s7, %s388_s7   ;;  %v1115_v13 = vphi %v1113_v13, %v1114_v13   ;;  %v1111_v12 = vphi %v1109_v12, %v400_v12  }
 0x143   : >> { %p385_p6 = scmp.ge.s32.totalorder %s388_s7, 32  }
 0x144   : >> { %v392_v15 = vmul.f32 0.5, %v391_v14  ;;  %v1121_v24 = vmov (%p385_p6), %v382_v8   ;;  %v1125_v25 = vmov (%p385_p6), %v378_v10   ;;  %s1129_s8 = smov (%p385_p6), 0  }
 0x146   : >> { %vm393_vm2 = vcmp.ge.f32.partialorder %v1329_v3, %v392_v15 }
 0x147   : >> { %v394_v17 = vsel %vm393_vm2, 1.0, %v1134_v16 }
 0x148   : >> { %v395_v18 = vsel %vm372_vm1, %v394_v17, 0.0 }
 0x149   : >> { %396 = vadd.xlane.f32.xlu0 %v395_v18 }
 0x1bc   : >> { %v397_v19 = vpop.xlane.xlu0 %396  ;;  %387 = sbr.rel (!%p385_p6) target bundleno = 322 (0x142), region = 124 }
 0x1bd   : >> { %vm398_vm3 = vcmp.ge.f32.partialorder %v397_v19, 5.0 }
 0x1be   : >> { %v1341_v13 = vsel %vm398_vm3, %v392_v15, %v1115_v13   ;;  %v400_v12 = vsel %vm398_vm3, %v1111_v12, %v392_v15  }
 0x1bf   : >> { %v1449_v20 = vmov %v1341_v13 }
 0x1c0   : >> { %v1114_v13 = vmov %v1449_v20   ;;  %vm401_vm4 = vcmp.ge.f32.partialorder (%p385_p6), %v1329_v3, %v1449_v20 }
 0x1c1   : > { %v402_v21 = vsel %vm401_vm4, %v1336_v11, 0.0 }
 0x1c2   : > { %v403_v22 = vsel %vm372_vm1, %v402_v21, 0.0 }
 0x1c3   : > { %404 = vadd.xlane.f32.xlu0 %v403_v22 }
 0x236   : > { %v405_v23 = vpop.xlane.xlu0 %404 }
 0x237 LB: >> { %v414_v26 = vadd.f32 %v1123_v24, %v1127_v25  ;;  %v1135_v28 = vmov 0.0   ;;  %s411_s8 = sadd.s32 1, %s1131_s8   ;;  %s1131_s8 = sphi %s1129_s8, %s411_s8   ;;  %v1127_v25 = vphi %v1125_v25, %v1126_v25   ;;  %v1123_v24 = vphi %v1121_v24, %v423_v24  }
 0x238   : >> { %p408_p7 = scmp.ge.s32.totalorder %s411_s8, 32  }
 0x239   : >> { %v415_v27 = vmul.f32 0.5, %v414_v26  ;;  %v472_v35 = vld [vmem:[%s305_s27] sm:$0xff] (%p408_p7)  ;;  %868 = vrcp.f32 (%p408_p7), %v405_v23  ;;  %s709_s10 = sld [smem:[#allocation2 + $0x2]] (%p408_p7)  ;;  %vm458_vm8 = vweird.f32 (%p408_p7), %v405_v23  ;;  %v464_v43 = vand.u32 (%p408_p7), 2147483648, %v405_v23  ;;  %s713_s6 = sshll.u32 (%p408_p7), %s1095_s19, 2 }
 0x23a   : > { %491 = vmatpush.msra.mxu1 (%p408_p7), %v472_v35  ;;  %s710_s30 = sld [smem:[#allocation2 + $0x1]] (%p408_p7)  ;;  %v462_v46 = vand.u32 (%p408_p7), 2147483647, %v405_v23  ;;  %s509_s14 = sadd.s32 (%p408_p7), %s1091_s18, %s713_s6 }
 0x23b   : >> { %vm416_vm5 = vcmp.ge.f32.partialorder %v1329_v3, %v415_v27  ;;  %s451_s25 = sld [smem:[#allocation2]] (%p408_p7)  ;;  %v465_v50 = vor.u32 (%p408_p7), 1.1754944e-38, %v464_v43  ;;  %s714_s26 = sshll.u32 (%p408_p7), %s509_s14, 3 }
 0x23c   : >> { %v417_v29 = vsel %vm416_vm5, 1.0, %v1135_v28  ;;  %vm463_vm12 = vcmp.eq.f32.partialorder (%p408_p7), %v462_v46, 8.507059e+37  ;;  %s511_s29 = scalar_lea.hbm (%p408_p7), %s1426_s4, %s714_s26  ;;  %s513_s5 = sshll.u32 (%p408_p7), %s341_s28, 4  ;;  %s514_s5 = int_to_ptr.vmem [resolvable:$true] %s513_s5 }
 0x23d   : >> { %v418_v30 = vsel %vm372_vm1, %v417_v29, 0.0  ;;  %s515_s20 = sshll.u32 (%p408_p7), %s511_s29, 4  ;;  %s498_s1 = scalar_lea.sflag (%p408_p7), [#allocation4], %s1309_s0  ;;  %s516_s20 = int_to_ptr.hbm [resolvable:$true] %s515_s20 }
 0x23e   : >> { %419 = vadd.xlane.f32.xlu0 %v418_v30  ;;  %s991_s21 = sshra.s32 (%p408_p7), %s516_s20, 4  ;;  %s997_s24 = scalar_lea.hbm (%p408_p7), %s1426_s4, 64  ;;  %s992_s21 = int_to_ptr.hbm [resolvable:$true] %s991_s21 }
 0x23f   : > { %v869_v36 = vpop.eup (%p408_p7), %868  ;;  %v430_v54 = vstv (%p408_p7), %s709_s10  ;;  %s993_s23 = scalar_lea.hbm (%p408_p7), %s992_s21, 8  ;;  %p998_p11 = scmp.lt.s32.totalorder (%p408_p7), %s992_s21, %s1426_s4 }
 0x240   : > { %v454_v37 = vmul.f32 (%p408_p7), %v869_v36, %v405_v23  ;;  %vm459_vm9 = vweird.f32 (%p408_p7), %v869_v36  ;;  %v448_v56 = vstv (%p408_p7), %s710_s30  ;;  %p994_p8 = scmp.ne.s32.totalorder (%p408_p7), %s992_s21, %s993_s23  ;;  %p999_p12 = scmp.lt.s32.totalorder (%p408_p7), %s997_s24, %s993_s23 }
 0x241   : > { %vm1360_vm10 = vmor (%p408_p7), %vm458_vm8, %vm459_vm9  ;;  %v452_v57 = vstv (%p408_p7), %s451_s25 }
 0x242   : > { %v455_v38 = vsub.f32 (%p408_p7), 1.0, %v454_v37  ;;  %p995_p9 = pnand (%p408_p7), %p994_p8, %p1265_p0  ;;  %p1000_p13 = por (%p408_p7), %p999_p12, %p998_p11 }
 0x244   : > { %v456_v40 = vmul.f32 (%p408_p7), %v869_v36, %v455_v38  ;;  %p996_p10 = pneg (%p408_p7), %p995_p9 }
 0x246   : > { %v457_v42 = vadd.f32 (%p408_p7), %v869_v36, %v456_v40  ;;  %p1001_p3 = pnand (%p408_p7), %p1000_p13, %p996_p10 }
 0x248   : > { %v461_v49 = vsel (%p408_p7), %vm1360_vm10, %v869_v36, %v457_v42 }
 0x249   : > { %v466_v58 = vsel (%p408_p7), %vm463_vm12, %v465_v50, %v461_v49 }
 0x24a   : > { %v467_v63 = vmul.f32 (%p408_p7), %v466_v58, %v452_v57 }
 0x2b0   : > { %410 = sbr.rel (!%p408_p7) target bundleno = 567 (0x237), region = 135 }
 0x2b1   : >> { %v420_v31 = vpop.xlane.xlu0 %419 }
 0x2b2   : >> { %vm421_vm6 = vcmp.ge.f32.partialorder %v420_v31, 6.0 }
 0x2b3   : >> { %v422_v32 = vsel %vm421_vm6, %v415_v27, %v1127_v25   ;;  %v423_v24 = vsel %vm421_vm6, %v1123_v24, %v415_v27  }
 0x2b4   : >> { %v1126_v25 = vmov %v422_v32   ;;  %vm424_vm7 = vcmp.ge.f32.partialorder (%p408_p7), %v1329_v3, %v422_v32 }
 0x2b5   : > { %v425_v33 = vsel %vm424_vm7, %v1336_v11, 0.0 }
 0x2b6   : > { %v426_v34 = vsel %vm372_vm1, %v425_v33, 0.0 }
 0x2b7   : > { %427 = vadd.xlane.f32.xlu0 %v426_v34 }
 0x32a   : > { %v428_v39 = vpop.xlane.xlu0 %427 }
 0x32b   : > { %870 = vrcp.f32 %v428_v39  ;;  %v442_v48 = vand.u32 2147483648, %v428_v39  ;;  %v440_v52 = vand.u32 2147483647, %v428_v39  ;;  %vm436_vm13 = vweird.f32 %v428_v39 }
 0x32d   : > { %v443_v55 = vor.u32 1.1754944e-38, %v442_v48  ;;  %vm441_vm15 = vcmp.eq.f32.partialorder %v440_v52, 8.507059e+37 }
 0x331   : > { %v871_v41 = vpop.eup %870 }
 0x332   : > { %v432_v44 = vmul.f32 %v871_v41, %v428_v39  ;;  %vm437_vm11 = vweird.f32 %v871_v41 }
 0x333   : > { %vm438_vm14 = vmor %vm436_vm13, %vm437_vm11 }
 0x334   : > { %v433_v47 = vsub.f32 1.0, %v432_v44 }
 0x336   : > { %v434_v51 = vmul.f32 %v871_v41, %v433_v47 }
 0x338   : > { %v435_v53 = vadd.f32 %v871_v41, %v434_v51 }
 0x33a   : > { %v439_v59 = vsel %vm438_vm14, %v871_v41, %v435_v53 }
 0x33b   : > { %v444_v60 = vsel %vm441_vm15, %v443_v55, %v439_v59 }
 0x33c   : > { %v445_v61 = vmul.f32 %v444_v60, %v430_v54  ;;  %v449_v62 = vmul.f32 %v448_v56, %v444_v60 }
 0x33e   : > { %v450_v0 = vadd.f32 %v449_v62, %v445_v61 }
 0x340   : > { %v468_v1 = vadd.f32 %v467_v63, %v450_v0  ;;  %v469_v2 = vsel %vm424_vm7, %v450_v0, 0.0 }
 0x342   : > { %v470_v4 = vsel %vm401_vm4, %v468_v1, %v469_v2 }
 0x343   : > { %v471_v5 = vmul.f32 %v1336_v11, %v470_v4 }
 0x345   : > { %711 = vmatmul.msk.f32.vlgmr.msra.gmra.mxu1 %vm372_vm1, %v471_v5 }
 0x3c2   : > { %v493_v6 = vpop.f32.mrf.mxu1 }
 0x3c3   : > { %496 = vst.msk [vmem:[%s341_s28] sm:$0xff] %vm345_vm0, %v493_v6 }
 0x3c4   : > { %1004 = shalt.err (!%p1001_p3)
}
 0x3c5   : > { %727 = dma.vmem_to_hbm [thread:$0]  (%p1265_p0), %s514_s5, 128, %s516_s20, %s498_s1  }
 0x3c6 PF: > { %p750_p4 = scmp.ge.s32.totalorder %s1107_s22, 2  ;;  %s527_s0 = sand.u32 1, %s1079_s15  }
 0x3c7   : > { %s528_s2 = scalar_lea.sflag [#allocation4], %s527_s0 }
 0x3c8   : > { %p744_p1 = pnand %p750_p4, %p1269_p2 }
 0x3ca   : > { %p745_p5 = pneg %p744_p1 }
 0x3cc   : > { %1074 = dma.done.wait (%p745_p5), %s528_s2, 128  }
 0x3cd   : > { %1076 = vsyncadd (%p745_p5), %s528_s2, 4294967168  ;;  %s24_s22 = sadd.s32 1, %s1107_s22   ;;  %s1452_s28 = sld [smem:[#allocation19_spill]] }
 0x3ce   : > { %p21_p6 = scmp.ge.s32.totalorder %s24_s22, 10   ;;  %s1453_s18 = sld [smem:[#allocation15_spill]] }
 0x3cf   : > { %s1454_s19 = sld [smem:[#allocation16_spill]]  ;;  %s1457_s15 = smov %s1083_s16 }
 0x3d0   : > { %s1455_s20 = sld [smem:[#allocation17_spill]]  ;;  %s1458_s16 = smov %s1087_s17 }
 0x3d1   : > { %s1456_s21 = sld [smem:[#allocation18_spill]]  ;;  %23 = sbr.rel (!%p21_p6) target bundleno = 14 (0xe), region = 146 }
 0x3d3   : > { %s1459_s17 = smov %s1452_s28 }
 0x3d6   :  { %534 = vsyncpa [#allocation3], 1 }
 0x3d7   :  { %536 = vsyncpa [#allocation3 + $0x1], 1 }
 0x3d8   :  { %537 = vsyncpa [#allocation8], 1 }
 0x3d9   :  { %539 = vsyncpa [#allocation8 + $0x1], 1 }
 0x3da   :  { %540 = vsyncpa [#allocation4], 1 }
 0x3db   :  { %542 = vsyncpa [#allocation4 + $0x1], 1 }
 0x3dc   :  { %543 = vsyncpa [#allocation5], 1 }
 0x3dd   :  { %545 = vsyncpa [#allocation5 + $0x1], 1 }

</bundles_post_ra>
